<compile_context>
chip_gen: v7x
topology: tpu7x:2x2x1
jax: 0.10.0
libtpu: 0.0.40
codegen_flags: <defaults>
</compile_context>

<pallas_src>
import functools

import jax
import jax.numpy as jnp
from jax.experimental import pallas as pl
from jax.experimental.pallas import tpu as pltpu


def _round_up(a, b):
    return (a + b - 1) // b * b


def _chip_generation():
    """Best-effort TPU generation from device_kind ('TPU v5 lite', 'TPU v6e', ...)."""
    try:
        kind = jax.devices()[0].device_kind.lower()
    except Exception:
        return 0
    for gen in (7, 6, 5):
        if f"v{gen}" in kind:
            return gen
    return 0


def _pick_row_tile(n, hc, hc_pad, heads, *, elem_bytes, budget_bytes,
                   resident_bufs, min_tiles):
    """Largest dst-row tile whose phase-2 working set fits the per-core VMEM budget."""
    n32 = _round_up(max(n, 1), 32)
    cap = n32
    if min_tiles > 1:
        # Leave at least `min_tiles` row tiles so both v7x TensorCores get work.
        cap = max(32, _round_up(-(-n32 // min_tiles), 32))
    tn = 32
    for cand in (512, 256, 128, 64, 32):
        if cand > n32 or cand > cap:
            continue
        n_pad = _round_up(n32, cand)
        need = (2 * cand * n_pad                                    # int8 adj, double-buffered
                + 5 * cand * n_pad * elem_bytes                     # softmax temporaries
                + resident_bufs * n_pad * hc * 2                    # bf16 projected feats
                + resident_bufs * _round_up(heads, 8) * n_pad * 4   # transposed src logits
                + 2 * cand * hc_pad * 4                             # f32 output slab (2 bufs)
                + 2 * cand * _round_up(heads, 128) * 4)             # dst-logit tiles
        if need <= budget_bytes:
            tn = cand
            break
    return tn, _round_up(n32, tn)


# --------------------------------------------------------------------------------------
# Phase 1: fused projection + all per-head attention logits (single MXU matmul per tile).
# --------------------------------------------------------------------------------------
def _project_kernel(x_ref, w_ref, xp_ref, alphas_ref, *, hc):
    # x_ref: [TN, f_in] bf16, w_ref: [f_in, HC + 2H] bf16 (= [W | W @ attmat], resident).
    y = jnp.dot(x_ref[...], w_ref[...], preferred_element_type=jnp.float32)
    xp_ref[...] = y[:, :hc].astype(xp_ref.dtype)     # bf16 projected features
    alphas_ref[...] = y[:, hc:]                      # [TN, 2H] f32: [dst logits | src logits]


# --------------------------------------------------------------------------------------
# Phase 2: per-dst-row-tile masked softmax attention + aggregation.
# --------------------------------------------------------------------------------------
def _attention_kernel(adj_ref, xp_ref, a_dst_ref, a_src_t_ref, bias_ref, out_ref, *,
                      heads, out_channels, negative_slope, pad_cols, compute_dtype):
    cdt = compute_dtype
    # Mask hoisted out of the head loop: one compare+select per tile.
    mask_add = jnp.where(adj_ref[...] != 0,
                         jnp.asarray(0.0, cdt), jnp.asarray(-1e30, cdt))   # [TN, Np]
    xp = xp_ref[...]                                   # [Np, HC] bf16 (resident)
    a_dst = a_dst_ref[...].astype(cdt)                 # [TN, H]
    a_src_t = a_src_t_ref[...].astype(cdt)             # [H, Np]

    head_outs = []
    for h in range(heads):                             # heads is small & static -> unrolled
        e = a_dst[:, h:h + 1] + a_src_t[h:h + 1, :]                        # [TN, Np]
        e = jnp.where(e > 0, e, negative_slope * e)                        # LeakyReLU
        e = e + mask_add                                                   # mask non-edges
        m = jnp.max(e, axis=-1, keepdims=True)
        p = jnp.exp(e - m)                             # masked entries underflow to exactly 0
        denom = jnp.sum(p, axis=-1, keepdims=True, dtype=jnp.float32)      # >= exp(0): self-loops
        attn = (p * pl.reciprocal(denom, approx=True).astype(cdt)).astype(jnp.bfloat16)
        xh = xp[:, h * out_channels:(h + 1) * out_channels]                # [Np, C] bf16
        head_outs.append(jnp.dot(attn, xh, preferred_element_type=jnp.float32))

    if pad_cols:                                       # single concat into the lane-dense slab
        head_outs.append(jnp.zeros((out_ref.shape[0], pad_cols), jnp.float32))
    out_ref[...] = (jnp.concatenate(head_outs, axis=-1) + bias_ref[...]).astype(out_ref.dtype)


# --------------------------------------------------------------------------------------
# Phase 3: head-diversity loss (orthogonal_reg=True branch, param-only, tiny).
# --------------------------------------------------------------------------------------
def _diversity_kernel(p_ref, out_ref, *, heads, diversity_weight):
    P = p_ref[...]                                                         # [H, C*C]
    gram = jnp.dot(P, P.T, preferred_element_type=jnp.float32)             # [H, H]
    row = jax.lax.broadcasted_iota(jnp.int32, (heads, heads), 0)
    col = jax.lax.broadcasted_iota(jnp.int32, (heads, heads), 1)
    g = gram * (row != col).astype(jnp.float32)
    fro = jnp.sqrt(jnp.sum(g * g))
    num_pairs = max(1, heads * (heads - 1) // 2)
    out_ref[...] = jnp.reshape(diversity_weight * fro / num_pairs, (1, 1))


# --------------------------------------------------------------------------------------
# Wrapper
# --------------------------------------------------------------------------------------
def _build_packed_weight(params, heads, out_channels):
    """[W | W @ attmat] so phase 1 needs a single MXU matmul (attmat is block-diagonal)."""
    C = out_channels
    HC = heads * C
    w = params["w"].astype(jnp.float32)
    attmat = jnp.zeros((HC, 2 * heads), jnp.float32)
    for h in range(heads):
        attmat = attmat.at[h * C:(h + 1) * C, h].set(params["att_dst"][h])
        attmat = attmat.at[h * C:(h + 1) * C, heads + h].set(params["att_src"][h])
    wa = w @ attmat                                    # [f_in, 2H]
    return jnp.concatenate([w, wa], axis=1).astype(jnp.bfloat16)


def _run_pipeline(x_bf, w_all, adj, bias_pad, *, grid, tn, np_pad, f_in, heads,
                  out_channels, hc, hc_pad, negative_slope, compute_dtype,
                  vmem_limit, single_buffer_residents):
    def resident(shape, imap):
        # Constant-index_map operands are fetched once; ask for a single buffer.
        if single_buffer_residents:
            return pl.BlockSpec(shape, imap, pipeline_mode=pl.Buffered(1))
        return pl.BlockSpec(shape, imap)

    cparams = pltpu.CompilerParams(dimension_semantics=("parallel",),
                                   vmem_limit_bytes=vmem_limit)

    # ---- phase 1: fused projection + logits (row-tiled, parallel across cores).
    xp, alphas = pl.pallas_call(
        functools.partial(_project_kernel, hc=hc),
        out_shape=(jax.ShapeDtypeStruct((np_pad, hc), jnp.bfloat16),
                   jax.ShapeDtypeStruct((np_pad, 2 * heads), jnp.float32)),
        grid=grid,
        in_specs=[
            pl.BlockSpec((tn, f_in), lambda i: (i, 0)),
            resident((f_in, hc + 2 * heads), lambda i: (0, 0)),
        ],
        out_specs=(
            pl.BlockSpec((tn, hc), lambda i: (i, 0)),
            pl.BlockSpec((tn, 2 * heads), lambda i: (i, 0)),
        ),
        compiler_params=cparams,
    )(x_bf, w_all)

    a_dst = alphas[:, :heads]                          # [Np, H]
    a_src_t = jnp.transpose(alphas[:, heads:])         # [H, Np]

    # ---- phase 2: attention + aggregation, tiled over destination rows.
    out_full = pl.pallas_call(
        functools.partial(_attention_kernel, heads=heads, out_channels=out_channels,
                          negative_slope=negative_slope, pad_cols=hc_pad - hc,
                          compute_dtype=compute_dtype),
        out_shape=jax.ShapeDtypeStruct((np_pad, hc_pad), jnp.float32),
        grid=grid,
        in_specs=[
            pl.BlockSpec((tn, np_pad), lambda i: (i, 0)),     # int8 adjacency tile (streamed)
            resident((np_pad, hc), lambda i: (0, 0)),         # bf16 projected feats (resident)
            pl.BlockSpec((tn, heads), lambda i: (i, 0)),      # dst logits tile
            resident((heads, np_pad), lambda i: (0, 0)),      # src logits (resident, transposed)
            resident((1, hc_pad), lambda i: (0, 0)),          # padded bias (resident)
        ],
        out_specs=pl.BlockSpec((tn, hc_pad), lambda i: (i, 0)),
        compiler_params=cparams,
    )(adj, xp, a_dst, a_src_t, bias_pad)
    return out_full


def diverse_gat_conv(x, edge_index, params, *, heads, out_channels,
                     negative_slope=0.2, diversity_weight=0.1):
    """Returns (out [N, heads*out_channels], diversity_loss scalar)."""
    N, f_in = x.shape
    C = out_channels
    HC = heads * C
    HC_pad = _round_up(HC, 128)

    # Generation-aware compute dtype / VMEM budget (per TensorCore).
    gen = _chip_generation()
    if gen >= 7:            # v7x: 64 MiB/TC, bf16 VALU/EUP, 2 cores -> keep >=2 row tiles
        compute_dtype, budget, vmem_limit, min_tiles = jnp.bfloat16, 40 << 20, 52 << 20, 2
    elif gen == 6:          # v6e: 128 MiB VMEM, bf16 VALU/EUP
        compute_dtype, budget, vmem_limit, min_tiles = jnp.bfloat16, 96 << 20, 110 << 20, 1
    elif gen == 5:          # v5e: 128 MiB VMEM, NO bf16 VPU/EUP -> keep softmax math in f32
        compute_dtype, budget, vmem_limit, min_tiles = jnp.float32, 96 << 20, 110 << 20, 1
    else:                   # unknown chip: conservative, keep default scoped VMEM limit
        compute_dtype, budget, vmem_limit, min_tiles = jnp.float32, 12 << 20, None, 1

    TN, Np = _pick_row_tile(N, HC, HC_pad, heads,
                            elem_bytes=jnp.dtype(compute_dtype).itemsize,
                            budget_bytes=budget, resident_bufs=1, min_tiles=min_tiles)
    grid = (Np // TN,)

    # ---- host/XLA glue: pad + bf16-cast node features, densify edges (int8 mask with
    # self-loops, PyG add_self_loops default), pack [W | W@attmat], pad bias to HC_pad.
    # TODO(synk): for large graphs replace the dense NxN int8 mask with scalar-prefetched
    # CSR row offsets (PrefetchScalarGridSpec) to avoid the O(N^2) HBM footprint.
    x_bf = jnp.pad(x, ((0, Np - N), (0, 0))).astype(jnp.bfloat16)
    diag = jnp.arange(Np)
    adj = jnp.zeros((Np, Np), jnp.int8)
    adj = adj.at[diag, diag].set(1)                    # self-loops (all rows, incl. padding)
    adj = adj.at[edge_index[1], edge_index[0]].set(1)  # adj[dst, src] = 1

    w_all = _build_packed_weight(params, heads, C)
    bias_pad = jnp.pad(params["bias"].reshape(1, HC).astype(jnp.float32),
                       ((0, 0), (0, HC_pad - HC)))

    kwargs = dict(grid=grid, tn=TN, np_pad=Np, f_in=f_in, heads=heads,
                  out_channels=C, hc=HC, hc_pad=HC_pad,
                  negative_slope=negative_slope, compute_dtype=compute_dtype,
                  vmem_limit=vmem_limit)
    try:
        out_full = _run_pipeline(x_bf, w_all, adj, bias_pad,
                                 single_buffer_residents=True, **kwargs)
    except Exception:
        # pl.Buffered(1) unsupported on this jax/libtpu combo: fall back to default pipeline.
        out_full = _run_pipeline(x_bf, w_all, adj, bias_pad,
                                 single_buffer_residents=False, **kwargs)

    out = out_full[:N, :HC]

    # ---- diversity loss (param-only, tiny; separate launch is negligible).
    P = params["head_projectors"].reshape(heads, C * C).astype(jnp.float32)
    loss = pl.pallas_call(
        functools.partial(_diversity_kernel, heads=heads,
                          diversity_weight=diversity_weight),
        out_shape=jax.ShapeDtypeStruct((1, 1), jnp.float32),
        grid=(1,),
        in_specs=[pl.BlockSpec(P.shape, lambda i: (0, 0))],
        out_specs=pl.BlockSpec((1, 1), lambda i: (0, 0)),
    )(P)

    return out, loss[0, 0]


def init_params(key, in_channels, out_channels, heads):
    k1, k2, k3, k4 = jax.random.split(key, 4)
    HC = heads * out_channels
    w = jax.random.normal(k1, (in_channels, HC), jnp.float32) / jnp.sqrt(in_channels)
    att_src = jax.random.normal(k2, (heads, out_channels), jnp.float32) * 0.1
    att_dst = jax.random.normal(k3, (heads, out_channels), jnp.float32) * 0.1
    bias = jnp.zeros((HC,), jnp.float32)               # PyG GATConv bias init = zeros
    raw = jax.random.normal(k4, (heads, out_channels, out_channels), jnp.float32)
    q, _ = jnp.linalg.qr(raw)                          # orthogonal init
    return {"w": w, "att_src": att_src, "att_dst": att_dst, "bias": bias,
            "head_projectors": q}


def _reference(x, edge_index, params, *, heads, out_channels, negative_slope,
               diversity_weight):
    """Pure-JAX f32 reference for correctness checking."""
    N = x.shape[0]
    C = out_channels
    src = jnp.concatenate([edge_index[0], jnp.arange(N, dtype=edge_index.dtype)])
    dst = jnp.concatenate([edge_index[1], jnp.arange(N, dtype=edge_index.dtype)])
    adj = jnp.zeros((N, N), jnp.float32).at[dst, src].set(1.0)
    xp = x @ params["w"]
    outs = []
    for h in range(heads):
        xh = xp[:, h * C:(h + 1) * C]
        a_s = jnp.sum(xh * params["att_src"][h], -1)
        a_d = jnp.sum(xh * params["att_dst"][h], -1)
        e = a_d[:, None] + a_s[None, :]
        e = jnp.where(e > 0, e, negative_slope * e)
        e = jnp.where(adj > 0, e, -1e30)
        p = jnp.exp(e - jnp.max(e, -1, keepdims=True)) * adj
        attn = p / jnp.sum(p, -1, keepdims=True)
        outs.append(attn @ xh)
    out = jnp.concatenate(outs, -1) + params["bias"]
    P = params["head_projectors"].reshape(heads, -1)
    g = P @ P.T
    g = g * (1.0 - jnp.eye(heads))
    loss = diversity_weight * jnp.sqrt(jnp.sum(g * g)) / max(1, heads * (heads - 1) // 2)
    return out, loss


if __name__ == "__main__":
    # Small shapes consistent with the module's forward:
    #   x: [num_nodes, in_channels], edge_index: [2, num_edges]
    N, F_IN, C_OUT, HEADS, E = 16, 8, 8, 4, 32

    key = jax.random.PRNGKey(0)
    kx, ke, kp = jax.random.split(key, 3)

    x = jax.random.normal(kx, (N, F_IN), jnp.float32)
    ks, kd = jax.random.split(ke)
    edge_index = jnp.stack([
        jax.random.randint(ks, (E,), 0, N),
        jax.random.randint(kd, (E,), 0, N),
    ]).astype(jnp.int32)

    params = init_params(kp, F_IN, C_OUT, HEADS)

    out, div_loss = diverse_gat_conv(
        x, edge_index, params,
        heads=HEADS, out_channels=C_OUT,
        negative_slope=0.2, diversity_weight=0.1,
    )
    jax.block_until_ready((out, div_loss))

    assert out.shape == (N, HEADS * C_OUT)
    assert div_loss.shape == ()
    assert bool(jnp.all(jnp.isfinite(out)))

    ref_out, ref_loss = _reference(
        x, edge_index, params,
        heads=HEADS, out_channels=C_OUT, negative_slope=0.2, diversity_weight=0.1)
    max_err = float(jnp.max(jnp.abs(out - ref_out)))
    loss_err = abs(float(div_loss - ref_loss))
    # bf16 MXU/VPU math + approx reciprocal => loose tolerance on the GAT output.
    assert max_err < 0.1, f"attention output mismatch: {max_err}"
    assert loss_err < 1e-4, f"diversity loss mismatch: {loss_err}"

    print("KERNEL_OK")
</pallas_src>

<mosaic_0001>
module attributes {stable_mosaic.version = 11 : i64} {
  func.func @_project_kernel(%arg0: i32, %arg1: memref<32x8xbf16, #tpu.memory_space<vmem>>, %arg2: memref<8x40xbf16, #tpu.memory_space<vmem>>, %arg3: memref<32x32xbf16, #tpu.memory_space<vmem>>, %arg4: memref<32x8xf32, #tpu.memory_space<vmem>>) attributes {dimension_semantics = [#tpu.dimension_semantics<parallel>], iteration_bounds = array<i64: 1>, scalar_prefetch = 0 : i64, scratch_operands = 0 : i64, tpu.core_type = #tpu.core_type<tc>, window_params = [{transform_indices = @transform_0, window_bounds = array<i64: 32, 8>}, {pipeline_mode = #tpu.pipeline_mode<synchronous>, transform_indices = @transform_1, window_bounds = array<i64: 8, 40>}, {transform_indices = @transform_2, window_bounds = array<i64: 32, 32>}, {transform_indices = @transform_3, window_bounds = array<i64: 32, 8>}]} {
    %c0 = arith.constant 0 : index
    %c0_0 = arith.constant 0 : index
    %0 = vector.load %arg1[%c0, %c0_0] : memref<32x8xbf16, #tpu.memory_space<vmem>>, vector<32x8xbf16>
    %c0_1 = arith.constant 0 : index
    %c0_2 = arith.constant 0 : index
    %1 = vector.load %arg2[%c0_1, %c0_2] : memref<8x40xbf16, #tpu.memory_space<vmem>>, vector<8x40xbf16>
    %cst = arith.constant dense<0.000000e+00> : vector<32x40xf32>
    %2 = tpu.matmul %0, %1, %cst {dimension_numbers = #tpu.dot_dimension_numbers<[1], [0], [0], [1], [0, 0, 1, 1], [], []>} : vector<32x8xbf16>, vector<8x40xbf16>, vector<32x40xf32> -> vector<32x40xf32>
    %3 = vector.extract_strided_slice %2 {offsets = [0, 0], sizes = [32, 32], strides = [1, 1]} : vector<32x40xf32> to vector<32x32xf32>
    %4 = arith.truncf %3 : vector<32x32xf32> to vector<32x32xbf16>
    %c0_3 = arith.constant 0 : index
    %c0_4 = arith.constant 0 : index
    %5 = vector.load %arg3[%c0_3, %c0_4] : memref<32x32xbf16, #tpu.memory_space<vmem>>, vector<32x32xbf16>
    tpu.vector_store %arg3[%c0_3, %c0_4], %4 {strides = array<i32>} : memref<32x32xbf16, #tpu.memory_space<vmem>>, vector<32x32xbf16>,
    %6 = vector.extract_strided_slice %2 {offsets = [0, 32], sizes = [32, 8], strides = [1, 1]} : vector<32x40xf32> to vector<32x8xf32>
    %c0_5 = arith.constant 0 : index
    %c0_6 = arith.constant 0 : index
    %7 = vector.load %arg4[%c0_5, %c0_6] : memref<32x8xf32, #tpu.memory_space<vmem>>, vector<32x8xf32>
    tpu.vector_store %arg4[%c0_5, %c0_6], %6 {strides = array<i32>} : memref<32x8xf32, #tpu.memory_space<vmem>>, vector<32x8xf32>,
    return
  }
  func.func @transform_0(%arg0: i32) -> (i32, i32) {
    %c0_i32 = arith.constant 0 : i32
    %c0_i32_0 = arith.constant 0 : i32
    return %arg0, %c0_i32 : i32, i32
  }
  func.func @transform_1(%arg0: i32) -> (i32, i32) {
    %c0_i32 = arith.constant 0 : i32
    %c0_i32_0 = arith.constant 0 : i32
    %c0_i32_1 = arith.constant 0 : i32
    return %c0_i32, %c0_i32_0 : i32, i32
  }
  func.func @transform_2(%arg0: i32) -> (i32, i32) {
    %c0_i32 = arith.constant 0 : i32
    %c0_i32_0 = arith.constant 0 : i32
    return %arg0, %c0_i32 : i32, i32
  }
  func.func @transform_3(%arg0: i32) -> (i32, i32) {
    %c0_i32 = arith.constant 0 : i32
    %c0_i32_0 = arith.constant 0 : i32
    return %arg0, %c0_i32 : i32, i32
  }
}

module attributes {stable_mosaic.version = 11 : i64} {
  func.func @_project_kernel(%arg0: i32, %arg1: memref<32x8xbf16, #tpu.memory_space<vmem>>, %arg2: memref<8x40xbf16, #tpu.memory_space<vmem>>, %arg3: memref<32x32xbf16, #tpu.memory_space<vmem>>, %arg4: memref<32x8xf32, #tpu.memory_space<vmem>>) attributes {dimension_semantics = [#tpu.dimension_semantics<parallel>], iteration_bounds = array<i64: 1>, scalar_prefetch = 0 : i64, scratch_operands = 0 : i64, tpu.core_type = #tpu.core_type<tc>, window_params = [{transform_indices = @transform_0, window_bounds = array<i64: 32, 8>}, {pipeline_mode = #tpu.pipeline_mode<synchronous>, transform_indices = @transform_1, window_bounds = array<i64: 8, 40>}, {transform_indices = @transform_2, window_bounds = array<i64: 32, 32>}, {transform_indices = @transform_3, window_bounds = array<i64: 32, 8>}]} {
    %c0 = arith.constant 0 : index
    %c0_0 = arith.constant 0 : index
    %0 = vector.load %arg1[%c0, %c0_0] : memref<32x8xbf16, #tpu.memory_space<vmem>>, vector<32x8xbf16>
    %c0_1 = arith.constant 0 : index
    %c0_2 = arith.constant 0 : index
    %1 = vector.load %arg2[%c0_1, %c0_2] : memref<8x40xbf16, #tpu.memory_space<vmem>>, vector<8x40xbf16>
    %cst = arith.constant dense<0.000000e+00> : vector<32x40xf32>
    %2 = tpu.matmul %0, %1, %cst {dimension_numbers = #tpu.dot_dimension_numbers<[1], [0], [0], [1], [0, 0, 1, 1], [], []>} : vector<32x8xbf16>, vector<8x40xbf16>, vector<32x40xf32> -> vector<32x40xf32>
    %3 = vector.extract_strided_slice %2 {offsets = [0, 0], sizes = [32, 32], strides = [1, 1]} : vector<32x40xf32> to vector<32x32xf32>
    %4 = arith.truncf %3 : vector<32x32xf32> to vector<32x32xbf16>
    %c0_3 = arith.constant 0 : index
    %c0_4 = arith.constant 0 : index
    %5 = vector.load %arg3[%c0_3, %c0_4] : memref<32x32xbf16, #tpu.memory_space<vmem>>, vector<32x32xbf16>
    tpu.vector_store %arg3[%c0_3, %c0_4], %4 {strides = array<i32>} : memref<32x32xbf16, #tpu.memory_space<vmem>>, vector<32x32xbf16>,
    %6 = vector.extract_strided_slice %2 {offsets = [0, 32], sizes = [32, 8], strides = [1, 1]} : vector<32x40xf32> to vector<32x8xf32>
    %c0_5 = arith.constant 0 : index
    %c0_6 = arith.constant 0 : index
    %7 = vector.load %arg4[%c0_5, %c0_6] : memref<32x8xf32, #tpu.memory_space<vmem>>, vector<32x8xf32>
    tpu.vector_store %arg4[%c0_5, %c0_6], %6 {strides = array<i32>} : memref<32x8xf32, #tpu.memory_space<vmem>>, vector<32x8xf32>,
    return
  }
  func.func @transform_0(%arg0: i32) -> (i32, i32) {
    %c0_i32 = arith.constant 0 : i32
    %c0_i32_0 = arith.constant 0 : i32
    return %arg0, %c0_i32 : i32, i32
  }
  func.func @transform_1(%arg0: i32) -> (i32, i32) {
    %c0_i32 = arith.constant 0 : i32
    %c0_i32_0 = arith.constant 0 : i32
    %c0_i32_1 = arith.constant 0 : i32
    return %c0_i32, %c0_i32_0 : i32, i32
  }
  func.func @transform_2(%arg0: i32) -> (i32, i32) {
    %c0_i32 = arith.constant 0 : i32
    %c0_i32_0 = arith.constant 0 : i32
    return %arg0, %c0_i32 : i32, i32
  }
  func.func @transform_3(%arg0: i32) -> (i32, i32) {
    %c0_i32 = arith.constant 0 : i32
    %c0_i32_0 = arith.constant 0 : i32
    return %arg0, %c0_i32 : i32, i32
  }
}

</mosaic_0001>

<bundles_post_ra>
// kernel: tpu_custom_call.1
= control target key start
LH: loop header
LB: loop body
LE: loop exit
PB: predicated region body
PF: predicated region fallthrough
CT: control target
= control target key end

     0   :  { %vm37_vm0 = vcmask 1043456   ;;  %vm30_vm1 = vcmask 64512   ;;  %s270_s0 = inlined_call_operand.vmem [shape: bf16[32,8], index: 0, kind: input, shape index: {}]   ;;  %s271_s1 = inlined_call_operand.vmem [shape: bf16[8,40], index: 1, kind: input, shape index: {}]   ;;  %s272_s2 = inlined_call_operand.hbm [shape: bf16[32,32], index: 2, kind: output, shape index: {0}]   ;;  %s273_s3 = inlined_call_operand.vmem [shape: f32[32,8], index: 3, kind: output, shape index: {1}]  }
   0x1   :  { %v19_v0 = vld [vmem:[%s271_s1] sm:$0xf]  ;;  %v178_v3 = vld [vmem:[%s270_s0 + $0x8] sm:$0xff]  }
   0x2   :  { %v177_v1 = vld [vmem:[%s270_s0] sm:$0xff]   ;;  %172 = vmatprep.subr.msk.bf16.mxu0 %vm37_vm0, %v19_v0  ;;  %v39_v2 = vsel %vm37_vm0, %v19_v0, 0 }
   0x3   :  { %167 = vmatpush3.bf16.msra.mxu0 %v39_v2  ;;  %168 = vmatprep.mubr.msk.bf16.mxu0 %vm30_vm1, %v177_v1 }
   0x4   :  { %9 = vsyncpa [#allocation3], 0  ;;  %vm106_vm2 = vcmask 257024   ;;  %s203_s1 = smov [#allocation2]   ;;  %s204_s19 = smov 96  }
   0x5   :  { %s136_s18 = sshll.u32 %s203_s1, 4  ;;  %s137_s18 = int_to_ptr.vmem [resolvable:$true] %s136_s18 }
   0x6   :  { %169 = vmatmul.mubr.msk.bf16.vlgmr.msra.gmra.mrb[0].mxu0 %vm30_vm1, %v178_v3  ;;  %s179_s0 = scalar_lea.vmem %s137_s18, 256  ;;  %p184_p1 = scmp.lt.s32.totalorder %s137_s18, %s137_s18 }
   0x7   :  { %p180_p0 = scmp.ne.s32.totalorder %s137_s18, %s179_s0  ;;  %p185_p2 = scmp.lt.s32.totalorder %s179_s0, %s179_s0 }
   0x9   :  { %p186_p3 = por %p185_p2, %p184_p1 }
   0xb   :  { %p187_p4 = pnand %p186_p3, %p180_p0 }
  0xd9   :  { %v170_v4 = vpop.f32.mrb[0].mxu0 }
  0xda   :  { %v161_v5 = vpack.c.bf16 %v170_v4, %v170_v4  ;;  %119 = vrot.lane.b32.xlu1 %v170_v4, %s204_s19  ;;  %v75_v6 = vpop.f32.mrb[1].mxu0 }
  0xdb   :  { %v159_v7 = vpack.c.bf16 %v75_v6, %v75_v6  ;;  %115 = vrot.lane.b32.xlu0 %v75_v6, %s204_s19  ;;  %v171_v8 = vpop.f32.mrb[2].mxu0 }
  0xdc   :  { %109 = vst.msk [vmem:[#allocation2 + $0x8] sm:$0xf] %vm106_vm2, %v161_v5  ;;  %v162_v9 = vpack.c.bf16 %v171_v8, %v171_v8  ;;  %v78_v10 = vpop.f32.mrb[3].mxu0 }
  0xdd   :  { %107 = vst.msk [vmem:[#allocation2] sm:$0xf] %vm106_vm2, %v159_v7  ;;  %v160_v11 = vpack.c.bf16 %v78_v10, %v78_v10 }
  0xde   :  { %110 = vst.msk [vmem:[#allocation2 + $0xc] sm:$0xf] %vm106_vm2, %v162_v9  ;;  %121 = vrot.lane.b32.xlu1 %v171_v8, %s204_s19 }
  0xdf   :  { %108 = vst.msk [vmem:[#allocation2 + $0x4] sm:$0xf] %vm106_vm2, %v160_v11  ;;  %117 = vrot.lane.b32.xlu0 %v78_v10, %s204_s19 }
  0xe0   :  { %190 = shalt.err (!%p187_p4)
}
  0xe1   :  { %s191_s22 = scalar_lea.hbm %s272_s2, 256 }
  0xe2   :  { %p192_p5 = scmp.ne.s32.totalorder %s272_s2, %s191_s22  ;;  %p195_p6 = scmp.lt.u32.totalorder %s191_s22, %s272_s2 }
  0xe4   :  { %p197_p7 = pnand %p195_p6, %p192_p5 }
  0xe6   :  { %200 = shalt.err (!%p197_p7)
}
  0xe7   :  { %s205_s27 = smov 64   ;;  %s206_s28 = smov 4  }
  0xe8   :  { %142 = dma.vmem_to_hbm [thread:$0]  %s137_s18, 256, %s272_s2, [#allocation3], %s205_s27, %s205_s27, %s206_s28  }
 0x14c   :  { %v120_v12 = vpop.permute.xlu1 %119 }
 0x14d   :  { %129 = vst.msk [vmem:[%s273_s3 + $0x10] sm:$0xff] %vm30_vm1, %v120_v12  ;;  %v116_v13 = vpop.permute.xlu0 %115 }
 0x14e   :  { %127 = vst.msk [vmem:[%s273_s3] sm:$0xff] %vm30_vm1, %v116_v13 }
 0x150   :  { %v122_v14 = vpop.permute.xlu1 %121 }
 0x151   :  { %130 = vst.msk [vmem:[%s273_s3 + $0x18] sm:$0xff] %vm30_vm1, %v122_v14  ;;  %v118_v15 = vpop.permute.xlu0 %117 }
 0x152   :  { %128 = vst.msk [vmem:[%s273_s3 + $0x8] sm:$0xff] %vm30_vm1, %v118_v15 }
 0x153   :  { %201 = dma.done.wait [#allocation3], 256  }
 0x154   :  { %202 = vsyncadd [#allocation3], 4294967040 }
 0x155   :  { %150 = vsyncpa [#allocation3], 1 }

// kernel: tpu_custom_call.1
= control target key start
LH: loop header
LB: loop body
LE: loop exit
PB: predicated region body
PF: predicated region fallthrough
CT: control target
= control target key end

     0   :  { %vm37_vm0 = vcmask 1043456   ;;  %vm30_vm1 = vcmask 64512   ;;  %s270_s0 = inlined_call_operand.vmem [shape: bf16[32,8], index: 0, kind: input, shape index: {}]   ;;  %s271_s1 = inlined_call_operand.vmem [shape: bf16[8,40], index: 1, kind: input, shape index: {}]   ;;  %s272_s2 = inlined_call_operand.hbm [shape: bf16[32,32], index: 2, kind: output, shape index: {0}]   ;;  %s273_s3 = inlined_call_operand.vmem [shape: f32[32,8], index: 3, kind: output, shape index: {1}]  }
   0x1   :  { %v19_v0 = vld [vmem:[%s271_s1] sm:$0xf]  ;;  %v178_v3 = vld [vmem:[%s270_s0 + $0x8] sm:$0xff]  }
   0x2   :  { %v177_v1 = vld [vmem:[%s270_s0] sm:$0xff]   ;;  %172 = vmatprep.subr.msk.bf16.mxu0 %vm37_vm0, %v19_v0  ;;  %v39_v2 = vsel %vm37_vm0, %v19_v0, 0 }
   0x3   :  { %167 = vmatpush3.bf16.msra.mxu0 %v39_v2  ;;  %168 = vmatprep.mubr.msk.bf16.mxu0 %vm30_vm1, %v177_v1 }
   0x4   :  { %9 = vsyncpa [#allocation3], 0  ;;  %vm106_vm2 = vcmask 257024   ;;  %s203_s1 = smov [#allocation2]   ;;  %s204_s19 = smov 96  }
   0x5   :  { %s136_s18 = sshll.u32 %s203_s1, 4  ;;  %s137_s18 = int_to_ptr.vmem [resolvable:$true] %s136_s18 }
   0x6   :  { %169 = vmatmul.mubr.msk.bf16.vlgmr.msra.gmra.mrb[0].mxu0 %vm30_vm1, %v178_v3  ;;  %s179_s0 = scalar_lea.vmem %s137_s18, 256  ;;  %p184_p1 = scmp.lt.s32.totalorder %s137_s18, %s137_s18 }
   0x7   :  { %p180_p0 = scmp.ne.s32.totalorder %s137_s18, %s179_s0  ;;  %p185_p2 = scmp.lt.s32.totalorder %s179_s0, %s179_s0 }
   0x9   :  { %p186_p3 = por %p185_p2, %p184_p1 }
   0xb   :  { %p187_p4 = pnand %p186_p3, %p180_p0 }
  0xd9   :  { %v170_v4 = vpop.f32.mrb[0].mxu0 }
  0xda   :  { %v161_v5 = vpack.c.bf16 %v170_v4, %v170_v4  ;;  %119 = vrot.lane.b32.xlu1 %v170_v4, %s204_s19  ;;  %v75_v6 = vpop.f32.mrb[1].mxu0 }
  0xdb   :  { %v159_v7 = vpack.c.bf16 %v75_v6, %v75_v6  ;;  %115 = vrot.lane.b32.xlu0 %v75_v6, %s204_s19  ;;  %v171_v8 = vpop.f32.mrb[2].mxu0 }
  0xdc   :  { %109 = vst.msk [vmem:[#allocation2 + $0x8] sm:$0xf] %vm106_vm2, %v161_v5  ;;  %v162_v9 = vpack.c.bf16 %v171_v8, %v171_v8  ;;  %v78_v10 = vpop.f32.mrb[3].mxu0 }
  0xdd   :  { %107 = vst.msk [vmem:[#allocation2] sm:$0xf] %vm106_vm2, %v159_v7  ;;  %v160_v11 = vpack.c.bf16 %v78_v10, %v78_v10 }
  0xde   :  { %110 = vst.msk [vmem:[#allocation2 + $0xc] sm:$0xf] %vm106_vm2, %v162_v9  ;;  %121 = vrot.lane.b32.xlu1 %v171_v8, %s204_s19 }
  0xdf   :  { %108 = vst.msk [vmem:[#allocation2 + $0x4] sm:$0xf] %vm106_vm2, %v160_v11  ;;  %117 = vrot.lane.b32.xlu0 %v78_v10, %s204_s19 }
  0xe0   :  { %190 = shalt.err (!%p187_p4)
}
  0xe1   :  { %s191_s22 = scalar_lea.hbm %s272_s2, 256 }
  0xe2   :  { %p192_p5 = scmp.ne.s32.totalorder %s272_s2, %s191_s22  ;;  %p195_p6 = scmp.lt.u32.totalorder %s191_s22, %s272_s2 }
  0xe4   :  { %p197_p7 = pnand %p195_p6, %p192_p5 }
  0xe6   :  { %200 = shalt.err (!%p197_p7)
}
  0xe7   :  { %s205_s27 = smov 64   ;;  %s206_s28 = smov 4  }
  0xe8   :  { %142 = dma.vmem_to_hbm [thread:$0]  %s137_s18, 256, %s272_s2, [#allocation3], %s205_s27, %s205_s27, %s206_s28  }
 0x14c   :  { %v120_v12 = vpop.permute.xlu1 %119 }
 0x14d   :  { %129 = vst.msk [vmem:[%s273_s3 + $0x10] sm:$0xff] %vm30_vm1, %v120_v12  ;;  %v116_v13 = vpop.permute.xlu0 %115 }
 0x14e   :  { %127 = vst.msk [vmem:[%s273_s3] sm:$0xff] %vm30_vm1, %v116_v13 }
 0x150   :  { %v122_v14 = vpop.permute.xlu1 %121 }
 0x151   :  { %130 = vst.msk [vmem:[%s273_s3 + $0x18] sm:$0xff] %vm30_vm1, %v122_v14  ;;  %v118_v15 = vpop.permute.xlu0 %117 }
 0x152   :  { %128 = vst.msk [vmem:[%s273_s3 + $0x8] sm:$0xff] %vm30_vm1, %v118_v15 }
 0x153   :  { %201 = dma.done.wait [#allocation3], 256  }
 0x154   :  { %202 = vsyncadd [#allocation3], 4294967040 }
 0x155   :  { %150 = vsyncpa [#allocation3], 1 }

</bundles_post_ra>
